<compile_context>
chip_gen: v5e
topology: v5e:2x2
jax: 0.10.0
libtpu: 0.0.40
codegen_flags: <defaults>
</compile_context>

<pallas_src>
import functools

import jax
import jax.numpy as jnp
from jax.experimental import pallas as pl
from jax.experimental.pallas import tpu as pltpu


# ---------------------------------------------------------------------------
# Kernels
# ---------------------------------------------------------------------------

def _channel_attention_rows_kernel(x_ref, w1t_ref, w2t_ref, out_ref, *, inv_hw):
    """Small-feature-map path: whole rows per grid step, no scratch needed.

    x_ref:   (TILE_B, C, HW)    several full batch rows
    w1t_ref: (C, hidden)        == torch fc[0].weight.T (resident)
    w2t_ref: (hidden, C)        == torch fc[2].weight.T (resident)
    out_ref: (TILE_B, 1, C)     per-channel attention weights
    """
    x = x_ref[...].astype(jnp.float32)                           # (TB, C, HW)
    avg = jnp.sum(x, axis=-1) * inv_hw                           # (TB, C)
    mx = jnp.max(x, axis=-1)                                     # (TB, C)
    # Shared MLP on stacked [avg; max]: 2 matmuls instead of 4, bigger M dim.
    stacked = jnp.concatenate([avg, mx], axis=0)                 # (2*TB, C)
    h = jnp.maximum(
        jnp.dot(stacked, w1t_ref[...], preferred_element_type=jnp.float32), 0.0)
    o = jnp.dot(h, w2t_ref[...], preferred_element_type=jnp.float32)  # (2*TB, C)
    tb = x.shape[0]
    attn = jax.nn.sigmoid(o[:tb, :] + o[tb:, :])                 # (TB, C)
    out_ref[...] = attn.reshape(out_ref.shape).astype(out_ref.dtype)


def _channel_attention_stream_kernel(x_ref, w1t_ref, w2t_ref, out_ref,
                                     sum_ref, max_ref, *, inv_hw, n_chunks):
    """Streaming path: grid = (B, num_s); reduction axis last.

    x_ref:   (1, C, TILE_S)      spatial tile of one batch row
    out_ref: (1, 1, C)
    sum_ref / max_ref: (1, C, 128) f32 VMEM scratch (deferred lane reduction)
    """
    s = pl.program_id(1)

    @pl.when(s == 0)
    def _init():
        sum_ref[...] = jnp.zeros_like(sum_ref)
        max_ref[...] = jnp.full_like(max_ref, -jnp.inf)

    if n_chunks > 0:
        # Deferred reduction: pure element-wise (VALU) accumulation of static
        # 128-lane chunks — no XLU reduce / relayout in the hot loop.
        for k in range(n_chunks):
            chunk = x_ref[:, :, k * 128:(k + 1) * 128].astype(jnp.float32)
            sum_ref[...] += chunk
            max_ref[...] = jnp.maximum(max_ref[...], chunk)
    else:
        # Tile not 128-lane aligned (rare fallback): direct per-tile reduce
        # into lane 0 of the scratch buffers.
        tile = x_ref[...].astype(jnp.float32)                    # (1, C, TILE_S)
        sum_ref[:, :, 0:1] += jnp.sum(tile, axis=-1, keepdims=True)
        max_ref[:, :, 0:1] = jnp.maximum(max_ref[:, :, 0:1],
                                         jnp.max(tile, axis=-1, keepdims=True))

    @pl.when(s == pl.num_programs(1) - 1)
    def _finalize():
        # Single lane-reduce + relayout per batch row (once, not per tile).
        avg = jnp.sum(sum_ref[...], axis=-1) * inv_hw            # (1, C)
        mx = jnp.max(max_ref[...], axis=-1)                      # (1, C)
        stacked = jnp.concatenate([avg, mx], axis=0)             # (2, C)
        h = jnp.maximum(
            jnp.dot(stacked, w1t_ref[...], preferred_element_type=jnp.float32),
            0.0)
        o = jnp.dot(h, w2t_ref[...], preferred_element_type=jnp.float32)
        attn = jax.nn.sigmoid(o[0:1, :] + o[1:2, :])             # (1, C)
        out_ref[...] = attn.reshape(out_ref.shape).astype(out_ref.dtype)


# ---------------------------------------------------------------------------
# Wrapper / tiling heuristics
# ---------------------------------------------------------------------------

def _vmem_budgets():
    """(per_x_buffer_bytes, vmem_limit_bytes), generation-aware.

    Conservative defaults are safe on v7x (64 MiB physical VMEM); if the chip
    reports more than 64 MiB (v5e / v6e: 128 MiB) use larger windows.
    """
    per_buf, limit = 10 << 20, 32 << 20
    try:
        if pltpu.get_tpu_info().vmem_capacity_bytes > (64 << 20):
            per_buf, limit = 20 << 20, 56 << 20
    except Exception:
        pass
    return per_buf, limit


def _pick_spatial_tile(hw, c, itemsize, per_buffer_bytes, max_tile):
    """Largest multiple of 128 dividing hw, capped by max_tile and by a
    per-buffer VMEM budget (the x tile is double-buffered by the pipeline).
    max_tile also bounds the static chunk-unroll length (max_tile // 128)."""
    cap = per_buffer_bytes // max(1, c * itemsize)
    cap = min(cap, max_tile, hw)
    cap = (cap // 128) * 128
    t = cap
    while t >= 128:
        if hw % t == 0:
            return t
        t -= 128
    # No lane-aligned divisor (or hw < 128): use the full spatial extent as a
    # single block (block dim == full array dim is always legal).
    return hw


def channel_attention(x, w1, w2, *, per_buffer_bytes=None, max_tile=8192,
                      vmem_limit_bytes=None):
    """x: (B, C, H, W) NCHW. w1: (hidden, C), w2: (C, hidden) (torch Linear layout).

    Returns the sigmoid channel-attention weights with shape (B, C, 1, 1).
    """
    B, C, H, W = x.shape
    hidden = w1.shape[0]
    hw = H * W
    itemsize = jnp.dtype(x.dtype).itemsize

    auto_per_buf, auto_limit = _vmem_budgets()
    if per_buffer_bytes is None:
        per_buffer_bytes = auto_per_buf
    if vmem_limit_bytes is None:
        vmem_limit_bytes = auto_limit

    x3 = x.reshape(B, C, hw)
    w1t = jnp.transpose(w1)   # (C, hidden)
    w2t = jnp.transpose(w2)   # (hidden, C)
    inv_hw = 1.0 / float(hw)
    row_bytes = C * hw * itemsize

    if row_bytes <= per_buffer_bytes:
        # ---- small-feature-map path: several full batch rows per grid step.
        tile_b = max(1, min(B, per_buffer_bytes // max(1, row_bytes)))
        if B >= 2:
            # Keep >= 2 grid steps so both TensorCores get work (v7x megacore).
            tile_b = min(tile_b, max(1, B // 2))
        while B % tile_b != 0:
            tile_b -= 1

        kernel = functools.partial(_channel_attention_rows_kernel, inv_hw=inv_hw)
        out = pl.pallas_call(
            kernel,
            out_shape=jax.ShapeDtypeStruct((B, 1, C), x.dtype),
            grid_spec=pltpu.PrefetchScalarGridSpec(
                num_scalar_prefetch=0,
                grid=(B // tile_b,),
                in_specs=[
                    pl.BlockSpec((tile_b, C, hw), lambda i: (i, 0, 0)),
                    pl.BlockSpec((C, hidden), lambda i: (0, 0)),   # resident
                    pl.BlockSpec((hidden, C), lambda i: (0, 0)),   # resident
                ],
                out_specs=pl.BlockSpec((tile_b, 1, C), lambda i: (i, 0, 0)),
            ),
            compiler_params=pltpu.CompilerParams(
                dimension_semantics=("parallel",),
                vmem_limit_bytes=vmem_limit_bytes,
            ),
        )(x3, w1t, w2t)
    else:
        # ---- streaming path: large spatial tiles, deferred lane reduction.
        tile_s = _pick_spatial_tile(hw, C, itemsize, per_buffer_bytes, max_tile)
        num_s = hw // tile_s
        n_chunks = tile_s // 128 if tile_s % 128 == 0 else 0

        kernel = functools.partial(_channel_attention_stream_kernel,
                                   inv_hw=inv_hw, n_chunks=n_chunks)
        out = pl.pallas_call(
            kernel,
            out_shape=jax.ShapeDtypeStruct((B, 1, C), x.dtype),
            grid_spec=pltpu.PrefetchScalarGridSpec(
                num_scalar_prefetch=0,
                grid=(B, num_s),                  # batch parallel, reduction last
                in_specs=[
                    pl.BlockSpec((1, C, tile_s), lambda b, s: (b, 0, s)),
                    pl.BlockSpec((C, hidden), lambda b, s: (0, 0)),   # resident
                    pl.BlockSpec((hidden, C), lambda b, s: (0, 0)),   # resident
                ],
                out_specs=pl.BlockSpec((1, 1, C), lambda b, s: (b, 0, 0)),
                scratch_shapes=[pltpu.VMEM((1, C, 128), jnp.float32),  # sum
                                pltpu.VMEM((1, C, 128), jnp.float32)], # max
            ),
            compiler_params=pltpu.CompilerParams(
                dimension_semantics=("parallel", "arbitrary"),
                vmem_limit_bytes=vmem_limit_bytes,
            ),
        )(x3, w1t, w2t)

    return out.reshape(B, C, 1, 1)


# ---------------------------------------------------------------------------
# Self-test
# ---------------------------------------------------------------------------

if __name__ == "__main__":
    key = jax.random.PRNGKey(0)
    kx, k1, k2, kx2, kx3 = jax.random.split(key, 5)

    C = 32
    reduction_ratio = 16
    hidden = C // reduction_ratio  # 2

    # Deterministic "Linear" weights (torch layout: (out_features, in_features)).
    w1 = 0.1 * jax.random.normal(k1, (hidden, C), dtype=jnp.float32)
    w2 = 0.1 * jax.random.normal(k2, (C, hidden), dtype=jnp.float32)

    def reference(xv):
        avg = jnp.mean(xv, axis=(2, 3))
        mx = jnp.max(xv, axis=(2, 3))

        def mlp(v):
            return jnp.maximum(v @ w1.T, 0.0) @ w2.T

        return jax.nn.sigmoid(mlp(avg) + mlp(mx)).reshape(
            xv.shape[0], xv.shape[1], 1, 1)

    # 1) Default: small feature map -> batched-rows path (grid over B).
    x = jax.random.normal(kx, (2, C, 16, 16), dtype=jnp.float32)
    out = channel_attention(x, w1, w2)
    jax.block_until_ready(out)
    assert out.shape == (2, C, 1, 1)
    assert jnp.allclose(out, reference(x), atol=1e-5, rtol=1e-5), "rows mismatch"

    # 2) Rows path with TILE_B > 1 (B=4, tiny maps -> 2 rows per grid step).
    x_b4 = jax.random.normal(kx3, (4, C, 8, 8), dtype=jnp.float32)
    out_b4 = channel_attention(x_b4, w1, w2)
    jax.block_until_ready(out_b4)
    assert jnp.allclose(out_b4, reference(x_b4), atol=1e-5, rtol=1e-5), \
        "rows(tile_b>1) mismatch"

    # 3) Force the streaming path: 128-lane tiles, 2 reduction steps per row.
    out_s = channel_attention(x, w1, w2, per_buffer_bytes=16 * 1024)
    jax.block_until_ready(out_s)
    assert jnp.allclose(out_s, reference(x), atol=1e-5, rtol=1e-5), \
        "stream mismatch"

    # 4) Streaming path with multiple 128-lane chunks per tile (tile_s=256).
    x_big = jax.random.normal(kx2, (2, C, 32, 32), dtype=jnp.float32)
    out_s2 = channel_attention(x_big, w1, w2, per_buffer_bytes=32 * 1024)
    jax.block_until_ready(out_s2)
    assert jnp.allclose(out_s2, reference(x_big), atol=1e-5, rtol=1e-5), \
        "stream(multi-chunk) mismatch"

    # 5) Non-128-aligned spatial extent through the streaming fallback branch.
    x_odd = jax.random.normal(kx, (2, C, 12, 12), dtype=jnp.float32)
    out_odd = channel_attention(x_odd, w1, w2, per_buffer_bytes=1024)
    jax.block_until_ready(out_odd)
    assert jnp.allclose(out_odd, reference(x_odd), atol=1e-5, rtol=1e-5), \
        "stream(fallback) mismatch"

    print("KERNEL_OK")
</pallas_src>

<mosaic_0001>
module attributes {stable_mosaic.version = 11 : i64} {
  func.func @_channel_attention_rows_kernel(%arg0: i32, %arg1: memref<1x32x256xf32, #tpu.memory_space<vmem>>, %arg2: memref<32x2xf32, #tpu.memory_space<vmem>>, %arg3: memref<2x32xf32, #tpu.memory_space<vmem>>, %arg4: memref<1x1x32xf32, #tpu.memory_space<vmem>>) attributes {dimension_semantics = [#tpu.dimension_semantics<parallel>], iteration_bounds = array<i64: 2>, scalar_prefetch = 0 : i64, scratch_operands = 0 : i64, tpu.core_type = #tpu.core_type<tc>, window_params = [{transform_indices = @transform_0, window_bounds = array<i64: 1, 32, 256>}, {pipeline_mode = #tpu.pipeline_mode<synchronous>, transform_indices = @transform_1, window_bounds = array<i64: 32, 2>}, {pipeline_mode = #tpu.pipeline_mode<synchronous>, transform_indices = @transform_2, window_bounds = array<i64: 2, 32>}, {transform_indices = @transform_3, window_bounds = array<i64: 1, 1, 32>}]} {
    %c0 = arith.constant 0 : index
    %c0_0 = arith.constant 0 : index
    %c0_1 = arith.constant 0 : index
    %0 = vector.load %arg1[%c0, %c0_0, %c0_1] : memref<1x32x256xf32, #tpu.memory_space<vmem>>, vector<1x32x256xf32>
    %cst = arith.constant dense<0.000000e+00> : vector<1x32xf32>
    %1 = vector.multi_reduction <add>, %0, %cst [2] : vector<1x32x256xf32> to vector<1x32xf32>
    %cst_2 = arith.constant 3.906250e-03 : f32
    %2 = vector.broadcast %cst_2 : f32 to vector<1x32xf32>
    %3 = arith.mulf %1, %2 : vector<1x32xf32>
    %cst_3 = arith.constant dense<0xFF800000> : vector<1x32xf32>
    %4 = vector.multi_reduction <maximumf>, %0, %cst_3 [2] : vector<1x32x256xf32> to vector<1x32xf32>
    %5 = tpu.concatenate %3, %4 in 0 : vector<1x32xf32>, vector<1x32xf32> -> vector<2x32xf32>
    %c0_4 = arith.constant 0 : index
    %c0_5 = arith.constant 0 : index
    %6 = vector.load %arg2[%c0_4, %c0_5] : memref<32x2xf32, #tpu.memory_space<vmem>>, vector<32x2xf32>
    %cst_6 = arith.constant dense<0.000000e+00> : vector<2x2xf32>
    %7 = tpu.matmul %5, %6, %cst_6 {dimension_numbers = #tpu.dot_dimension_numbers<[1], [0], [0], [1], [0, 0, 1, 1], [], []>} : vector<2x32xf32>, vector<32x2xf32>, vector<2x2xf32> -> vector<2x2xf32>
    %cst_7 = arith.constant 0.000000e+00 : f32
    %8 = vector.broadcast %cst_7 : f32 to vector<2x2xf32>
    %9 = arith.maximumf %7, %8 : vector<2x2xf32>
    %c0_8 = arith.constant 0 : index
    %c0_9 = arith.constant 0 : index
    %10 = vector.load %arg3[%c0_8, %c0_9] : memref<2x32xf32, #tpu.memory_space<vmem>>, vector<2x32xf32>
    %cst_10 = arith.constant dense<0.000000e+00> : vector<2x32xf32>
    %11 = tpu.matmul %9, %10, %cst_10 {dimension_numbers = #tpu.dot_dimension_numbers<[1], [0], [0], [1], [0, 0, 1, 1], [], []>} : vector<2x2xf32>, vector<2x32xf32>, vector<2x32xf32> -> vector<2x32xf32>
    %12 = vector.extract_strided_slice %11 {offsets = [0, 0], sizes = [1, 32], strides = [1, 1]} : vector<2x32xf32> to vector<1x32xf32>
    %13 = vector.extract_strided_slice %11 {offsets = [1, 0], sizes = [1, 32], strides = [1, 1]} : vector<2x32xf32> to vector<1x32xf32>
    %14 = arith.addf %12, %13 : vector<1x32xf32>
    %15 = arith.negf %14 : vector<1x32xf32>
    %16 = math.exp %15 : vector<1x32xf32>
    %cst_11 = arith.constant 1.000000e+00 : f32
    %17 = vector.broadcast %cst_11 : f32 to vector<1x32xf32>
    %18 = arith.addf %17, %16 : vector<1x32xf32>
    %19 = arith.divf %17, %18 : vector<1x32xf32>
    %20 = vector.shape_cast %19 : vector<1x32xf32> to vector<1x1x32xf32>
    %c0_12 = arith.constant 0 : index
    %c0_13 = arith.constant 0 : index
    %c0_14 = arith.constant 0 : index
    %21 = vector.load %arg4[%c0_12, %c0_13, %c0_14] : memref<1x1x32xf32, #tpu.memory_space<vmem>>, vector<1x1x32xf32>
    tpu.vector_store %arg4[%c0_12, %c0_13, %c0_14], %20 {strides = array<i32>} : memref<1x1x32xf32, #tpu.memory_space<vmem>>, vector<1x1x32xf32>,
    return
  }
  func.func @transform_0(%arg0: i32) -> (i32, i32, i32) {
    %c0_i32 = arith.constant 0 : i32
    %c0_i32_0 = arith.constant 0 : i32
    %c0_i32_1 = arith.constant 0 : i32
    return %arg0, %c0_i32, %c0_i32_0 : i32, i32, i32
  }
  func.func @transform_1(%arg0: i32) -> (i32, i32) {
    %c0_i32 = arith.constant 0 : i32
    %c0_i32_0 = arith.constant 0 : i32
    %c0_i32_1 = arith.constant 0 : i32
    return %c0_i32, %c0_i32_0 : i32, i32
  }
  func.func @transform_2(%arg0: i32) -> (i32, i32) {
    %c0_i32 = arith.constant 0 : i32
    %c0_i32_0 = arith.constant 0 : i32
    %c0_i32_1 = arith.constant 0 : i32
    return %c0_i32, %c0_i32_0 : i32, i32
  }
  func.func @transform_3(%arg0: i32) -> (i32, i32, i32) {
    %c0_i32 = arith.constant 0 : i32
    %c0_i32_0 = arith.constant 0 : i32
    %c0_i32_1 = arith.constant 0 : i32
    return %arg0, %c0_i32, %c0_i32_0 : i32, i32, i32
  }
}

</mosaic_0001>

<bundles_post_ra>
// kernel: tpu_custom_call.1
= control target key start
LH: loop header
LB: loop body
LE: loop exit
PB: predicated region body
PF: predicated region fallthrough
CT: control target
= control target key end

     0   :  { %8 = vsyncpa [#allocation3], 0  ;;  %s752_s0 = inlined_call_operand.hbm [shape: f32[2,32,256], index: 0, kind: input, shape index: {}]   ;;  %s753_s1 = inlined_call_operand.vmem [shape: f32[32,2], index: 1, kind: input, shape index: {}]   ;;  %s754_s2 = inlined_call_operand.vmem [shape: f32[2,32], index: 2, kind: input, shape index: {}]   ;;  %s755_s3 = inlined_call_operand.hbm [shape: f32[2,1,32], index: 3, kind: output, shape index: {}]  }
   0x1   :  { %10 = vsyncpa [#allocation3 + $0x1], 0 }
   0x2   :  { %11 = vsyncpa [#allocation4], 0 }
   0x3   :  { %13 = vsyncpa [#allocation4 + $0x1], 0  ;;  %s609_s12 = smov 0   ;;  %s611_s13 = smov 0  }
   0x4   :  { %s613_s14 = smov 0   ;;  %s615_s15 = smov 0  }
   0x5 LB: > { %s630_s16 = sadd.s32 4294967295, %s585_s15   ;;  %s422_s17 = sadd.s32 4294967294, %s585_s15   ;;  %s585_s15 = sphi %s615_s15, %s765_s15   ;;  %s581_s14 = sphi %s613_s14, %s764_s14   ;;  %s577_s13 = sphi %s611_s13, %s763_s13   ;;  %s573_s12 = sphi %s609_s12, %s762_s12  }
   0x6   : > { %s634_s18 = sadd.s32 1, %s585_s15   ;;  %s26_s19 = sadd.s32 1, %s581_s14 }
   0x7   : > { %s23_s20 = ssub.s32 %s585_s15, %s634_s18  ;;  %p33_p0 = scmp.ne.s32.totalorder %s581_s14, %s577_s13 }
   0x8   : > { %p24_p1 = scmp.eq.s32.totalorder %s23_s20, 0  ;;  %p34_p2 = scmp.eq.s32.totalorder %s585_s15, 0 }
   0x9   : > { %p39_p3 = scmp.ne.s32.totalorder %s577_s13, %s573_s12  ;;  %p40_p4 = scmp.eq.s32.totalorder %s630_s16, 0 }
   0xa   : > { %s646_s21 = scalar_select %p24_p1, %s581_s14, %s26_s19  }
   0xb   : > { %p648_p5 = por %p34_p2, %p33_p0  ;;  %p652_p6 = por %p40_p4, %p39_p3 }
   0xc   : > { %p105_p7 = scmp.eq.s32.totalorder %s630_s16, 1  ;;  %p111_p8 = scmp.eq.s32.totalorder %s422_s17, 1 }
   0xd   : > { %p449_p10 = scmp.lt.s32.totalorder %s585_s15, 2  ;;  %s137_s26 = sand.u32 1, %s581_s14  }
   0xe   : > { %p659_p11 = por %p105_p7, %p33_p0  ;;  %p663_p12 = por %p111_p8, %p39_p3 }
   0xf   : > { %s436_s27 = sshll.u32 %s585_s15, 6  ;;  %s425_s28 = sshll.u32 %s137_s26, 6 }
  0x10   : > { %s146_s4 = scalar_lea.hbm %s752_s0, %s436_s27  ;;  %s141_s6 = scalar_lea.vmem [#allocation2], %s425_s28 }
  0x11   : > { %s147_s5 = sshll.u32 %s146_s4, 4  ;;  %s149_s7 = sshll.u32 %s141_s6, 4  ;;  %s148_s5 = int_to_ptr.hbm [resolvable:$true] %s147_s5  ;;  %s150_s7 = int_to_ptr.vmem [resolvable:$true] %s149_s7 }
  0x12   : > { %p674_p13 = pnand %p449_p10, %p648_p5  ;;  %p428_p0 = scmp.ge.s32.totalorder %s585_s15, 1 }
  0x13   : > { %p157_p1 = scmp.lt.s32.totalorder %s585_s15, 3  ;;  %s138_s9 = scalar_lea.sflag [#allocation3], %s137_s26 }
  0x14   : > { %s489_s10 = sshra.s32 %s148_s5, 4  ;;  %p493_p3 = pneg %p674_p13  ;;  %s490_s10 = int_to_ptr.hbm [resolvable:$true] %s489_s10 }
  0x15   : > { %s491_s11 = scalar_lea.hbm %s490_s10, 64  ;;  %s496_s20 = scalar_lea.hbm %s752_s0, 128 }
  0x16   : > { %p492_p2 = scmp.ne.s32.totalorder %s490_s10, %s491_s11  ;;  %p497_p5 = scmp.lt.s32.totalorder %s490_s10, %s752_s0 }
  0x17   : > { %p498_p8 = scmp.lt.s32.totalorder %s496_s20, %s491_s11 }
  0x18   : > { %p494_p4 = pnand %p493_p3, %p492_p2 }
  0x19   : > { %p499_p10 = por %p498_p8, %p497_p5 }
  0x1a   : > { %p495_p7 = pneg %p494_p4 }
  0x1c   : > { %p500_p9 = pnand %p499_p10, %p495_p7 }
  0x1e   : > { %503 = shalt.err (!%p500_p9)
}
  0x1f   : > { %s587_s26 = smov 256   ;;  %s588_s28 = smov 16  }
  0x20   : > { %444 = dma.hbm_to_vmem [thread:$0]  (!%p674_p13), %s148_s5, 1024, %s150_s7, %s138_s9, %s587_s26, %s587_s26, %s588_s28  }
  0x21   : > { %p158_p2 = pnand %p428_p0, %p157_p1 }
  0x22   : > { %s695_s29 = sand.u32 (!%p158_p2), 1, %s577_s13  }
  0x23   : > { %161 = sbr.rel (%p158_p2) target bundleno = 470 (0x1d6), region = 32  ;;  %s429_s30 = sshll.u32 (!%p158_p2), %s695_s29, 6 }
  0x24   : > { %s164_s4 = scalar_lea.sflag (!%p158_p2), [#allocation3], %s695_s29  ;;  %s167_s6 = scalar_lea.vmem (!%p158_p2), [#allocation2], %s429_s30 }
  0x28   : > { %564 = dma.done.wait (%p652_p6), %s164_s4, 1024  }
  0x29   : > { %566 = vsyncadd (%p652_p6), %s164_s4, 4294966272  ;;  %v190_v0 = vld [vmem:[%s167_s6] sm:$0xff]  ;;  %v191_v1 = vld [vmem:[%s167_s6 + $0x8] sm:$0xff]  ;;  %v230_v23 = vlaneseq  ;;  %vm235_vm0 = vcmask 130112   ;;  %vm239_vm1 = vcmask 195712   ;;  %vm243_vm2 = vcmask 261312   ;;  %s352_s26 = scalar_lea.hbm %s755_s3, %s630_s16 }
  0x2a   : > { %v194_v2 = vld [vmem:[%s167_s6 + $0x20] sm:$0xff]  ;;  %v214_v3 = vmax.f32 %v190_v0, %v191_v1  ;;  %v198_v4 = vadd.f32 %v191_v1, %v190_v0  ;;  %v195_v5 = vld [vmem:[%s167_s6 + $0x28] sm:$0xff]  ;;  %v192_v7 = vld [vmem:[%s167_s6 + $0x10] sm:$0xff]  ;;  %vm258_vm3 = vcmask 1040384   ;;  %vm264_vm4 = vcmask 261120   ;;  %s189_s28 = scalar_lea.vmem [#allocation5], %s695_s29 }
  0x2b   : > { %v204_v6 = vadd.f32 %v195_v5, %v194_v2  ;;  %v193_v8 = vld [vmem:[%s167_s6 + $0x18] sm:$0xff]  ;;  %v196_v9 = vld [vmem:[%s167_s6 + $0x30] sm:$0xff]  ;;  %v220_v14 = vmax.f32 %v194_v2, %v195_v5  ;;  %v261_v18 = vld [vmem:[%s753_s1 + $0x8] sm:$0xff]  ;;  %v231_v24 = vand.u32 127, %v230_v23  ;;  %vm294_vm5 = vcmask 1041408   ;;  %s354_s30 = sshll.u32 %s189_s28, 4  ;;  %s355_s30 = int_to_ptr.vmem [resolvable:$true] %s354_s30 }
  0x2c   : > { %215 = vmax.xlane.f32.xlu2 %v214_v3  ;;  %199 = vadd.xlane.f32.xlu0 %v198_v4  ;;  %v197_v10 = vld [vmem:[%s167_s6 + $0x38] sm:$0xff]  ;;  %v217_v11 = vmax.f32 %v192_v7, %v193_v8  ;;  %v201_v12 = vadd.f32 %v193_v8, %v192_v7  ;;  %v262_v17 = vld [vmem:[%s753_s1 + $0x10] sm:$0xff]  ;;  %v260_v19 = vld [vmem:[%s753_s1] sm:$0xff]  ;;  %vm290_vm6 = vcmask 15360   ;;  %s356_s4 = sshll.u32 %s352_s26, 4  ;;  %vm341_vm10 = vcmask 253952   ;;  %s357_s4 = int_to_ptr.hbm [resolvable:$true] %s356_s4 }
  0x2d   : > { %205 = vadd.xlane.f32.xlu1 %v204_v6  ;;  %v207_v13 = vadd.f32 %v197_v10, %v196_v9  ;;  %v223_v15 = vmax.f32 %v196_v9, %v197_v10  ;;  %v263_v16 = vld [vmem:[%s753_s1 + $0x18] sm:$0xff]  ;;  %v233_v27 = vadd.s32 4294967288, %v231_v24  ;;  %v237_v30 = vadd.s32 4294967280, %v231_v24  ;;  %v289_v52 = vld [vmem:[%s754_s2] sm:$0x3]  ;;  %s344_s16 = scalar_lea.sflag [#allocation4], %s695_s29 }
  0x2e   : > { %280 = vmatpush.msra.mxu0 %v263_v16  ;;  %v241_v35 = vadd.s32 4294967272, %v231_v24  ;;  %431 = vmatpush.msk.msra.mxu1 %vm294_vm5, %v289_v52  ;;  %s533_s6 = sshra.s32 %s357_s4, 4  ;;  %s539_s8 = scalar_lea.hbm %s755_s3, 2  ;;  %s534_s6 = int_to_ptr.hbm [resolvable:$true] %s533_s6 }
  0x2f   : > { %s535_s23 = scalar_lea.hbm %s534_s6, 1  ;;  %p540_p0 = scmp.lt.s32.totalorder %s534_s6, %s755_s3 }
  0x30   : > { %281 = vmatpush.msra.mxu0 %v262_v17  ;;  %p536_p6 = scmp.ne.s32.totalorder %s534_s6, %s535_s23  ;;  %p541_p1 = scmp.lt.s32.totalorder %s539_s8, %s535_s23 }
  0x32   : > { %282 = vmatpush.msra.mxu0 %v261_v18  ;;  %p537_p9 = pnand %p536_p6, %p659_p11  ;;  %p542_p3 = por %p541_p1, %p540_p0 }
  0x34   : > { %218 = vmax.xlane.f32.xlu2 %v217_v11  ;;  %202 = vadd.xlane.f32.xlu0 %v201_v12  ;;  %p538_p13 = pneg %p537_p9 }
  0x35   : > { %208 = vadd.xlane.f32.xlu1 %v207_v13  ;;  %283 = vmatpush.msra.mxu0 %v260_v19 }
  0x36   : > { %p543_p4 = pnand %p542_p3, %p538_p13 }
  0x3c   : > { %221 = vmax.xlane.f32.xlu0 %v220_v14 }
  0x3d   : > { %224 = vmax.xlane.f32.xlu1 %v223_v15 }
  0x9f   : > { %v200_v20 = vpop.xlane.xlu0 %199  ;;  %v216_v21 = vpop.xlane.xlu2 %215 }
  0xa0   : > { %v206_v22 = vpop.xlane.xlu1 %205  ;;  %v210_v25 = vmul.f32 0.00390625, %v200_v20  ;;  %v250_v37 = vperm.slane %v216_v21, %v231_v24 }
  0xa1   : > { %v212_v31 = vmul.f32 0.00390625, %v206_v22 }
  0xa2   : > { %v232_v34 = vperm.slane %v210_v25, %v231_v24 }
  0xa3   : > { %v238_v40 = vperm.slane %v212_v31, %v237_v30 }
  0xa7   : > { %v203_v26 = vpop.xlane.xlu0 %202  ;;  %v219_v32 = vpop.xlane.xlu2 %218 }
  0xa8   : > { %v211_v28 = vmul.f32 0.00390625, %v203_v26  ;;  %v209_v29 = vpop.xlane.xlu1 %208  ;;  %v251_v38 = vperm.slane %v219_v32, %v233_v27 }
  0xa9   : > { %v213_v36 = vmul.f32 0.00390625, %v209_v29 }
  0xaa   : > { %v234_v33 = vperm.slane %v211_v28, %v233_v27  ;;  %v252_v46 = vsel %vm235_vm0, %v251_v38, %v250_v37 }
  0xab   : > { %v242_v41 = vperm.slane %v213_v36, %v241_v35 }
  0xac   : > { %v236_v39 = vsel %vm235_vm0, %v234_v33, %v232_v34 }
  0xad   : > { %v240_v45 = vsel %vm239_vm1, %v238_v40, %v236_v39 }
  0xae   : > { %v244_v49 = vsel %vm243_vm2, %v242_v41, %v240_v45 }
  0xaf   : > { %v222_v42 = vpop.xlane.xlu0 %221 }
  0xb0   : > { %v253_v43 = vperm.slane %v222_v42, %v237_v30  ;;  %v225_v44 = vpop.xlane.xlu1 %224 }
  0xb1   : > { %v255_v47 = vperm.slane %v225_v44, %v241_v35 }
  0xb2   : > { %v254_v48 = vsel %vm239_vm1, %v253_v43, %v252_v46 }
  0xb3   : > { %v256_v50 = vsel %vm243_vm2, %v255_v47, %v254_v48 }
  0xb4   : > { %v259_v51 = vsel %vm258_vm3, %v244_v49, %v256_v50 }
  0xb5   : > { %430 = vmatmul.msk.f32.vlgmr.msra.gmra.mxu0 %vm264_vm4, %v259_v51 }
 0x132   : > { %v285_v53 = vpop.f32.mrf.mxu0 }
 0x133   : > { %v288_v54 = vmax.f32 %v285_v53, 0.0 }
 0x135   : > { %432 = vmatmul.msk.f32.vlgmr.msra.gmra.mxu1 %vm290_vm6, %v288_v54 }
 0x1b2   : > { %v315_v55 = vpop.f32.mrf.mxu1 }
 0x1b3   : > { %v319_v56 = vrot.slane %v315_v55, 1 }
 0x1b5   : > { %v321_v57 = vadd.f32 %v319_v56, %v315_v55 }
 0x1b7   : > { %v433_v58 = vmul.f32 -1.442695, %v321_v57 }
 0x1b9   : > { %485 = vpow2.f32 %v433_v58 }
 0x1bf   : > { %v486_v59 = vpop.eup %485 }
 0x1c0   : > { %v325_v60 = vadd.f32 1.0, %v486_v59 }
 0x1c2   : > { %487 = vrcp.f32 %v325_v60  ;;  %v337_v0 = vand.u32 2147483648, %v325_v60  ;;  %v335_v2 = vand.u32 2147483647, %v325_v60  ;;  %vm331_vm8 = vweird.f32 %v325_v60 }
 0x1c4   : > { %v338_v4 = vor.u32 1.1754944e-38, %v337_v0  ;;  %vm336_vm11 = vcmp.eq.f32.partialorder %v335_v2, 8.507059e+37 }
 0x1c8   : > { %v488_v61 = vpop.eup %487 }
 0x1c9   : > { %v327_v62 = vmul.f32 %v488_v61, %v325_v60  ;;  %vm332_vm7 = vweird.f32 %v488_v61 }
 0x1ca   : > { %vm333_vm9 = vmor %vm331_vm8, %vm332_vm7 }
 0x1cb   : > { %v328_v63 = vsub.f32 1.0, %v327_v62 }
 0x1cd   : > { %v329_v1 = vmul.f32 %v488_v61, %v328_v63 }
 0x1cf   : > { %v330_v3 = vadd.f32 %v488_v61, %v329_v1 }
 0x1d1   : > { %v334_v5 = vsel %vm333_vm9, %v488_v61, %v330_v3 }
 0x1d2   : > { %v339_v6 = vsel %vm336_vm11, %v338_v4, %v334_v5 }
 0x1d3   : > { %342 = vst.msk [vmem:[%s189_s28] sm:$0x1] %vm341_vm10, %v339_v6 }
 0x1d4   : > { %546 = shalt.err (!%p543_p4)
}
 0x1d5   : > { %439 = dma.vmem_to_hbm [thread:$0]  (%p659_p11), %s355_s30, 16, %s357_s4, %s344_s16  }
 0x1d6 PF: > { %s368_s29 = sand.u32 1, %s573_s12   ;;  %p761_p7 = scmp.ge.s32.totalorder %s585_s15, 2 }
 0x1d7   : > { %s369_s11 = scalar_lea.sflag [#allocation4], %s368_s29 }
 0x1d8   : > { %p446_p5 = pnand %p761_p7, %p663_p12 }
 0x1da   : > { %p447_p8 = pneg %p446_p5 }
 0x1dc   : > { %568 = dma.done.wait (%p447_p8), %s369_s11, 16  }
 0x1dd   : > { %570 = vsyncadd (%p447_p8), %s369_s11, 4294967280  ;;  %p16_p10 = scmp.ge.s32.totalorder %s634_s18, 4   ;;  %s762_s12 = smov %s577_s13 }
 0x1de   : > { %s763_s13 = smov %s581_s14  ;;  %s764_s14 = smov %s646_s21 }
 0x1df   : > { %s765_s15 = smov %s634_s18  ;;  %18 = sbr.rel (!%p16_p10) target bundleno = 5 (0x5), region = 77 }
 0x1e4   :  { %374 = vsyncpa [#allocation3], 1 }
 0x1e5   :  { %376 = vsyncpa [#allocation3 + $0x1], 1 }
 0x1e6   :  { %377 = vsyncpa [#allocation4], 1 }
 0x1e7   :  { %379 = vsyncpa [#allocation4 + $0x1], 1 }

</bundles_post_ra>
